<compile_context>
chip_gen: v5e
topology: v5e:2x2
jax: 0.10.0
libtpu: 0.0.40
codegen_flags: <defaults>
</compile_context>

<pallas_src>
import jax
import jax.numpy as jnp
from jax import lax
from jax.experimental import pallas as pl
from jax.experimental.pallas import tpu as pltpu


def egnn_net_kernel(
    x_ref, s_ref, t_ref, ef_ref,
    v1_ref, kv1_ref, qv1_ref, wae1_ref, we1_ref, ba1_ref, wcx1_ref, wca1_ref, bc1_ref,
    v2_ref, kv2_ref, qv2_ref, wae2_ref, we2_ref, ba2_ref, wcx2_ref, wca2_ref, bc2_ref,
    out_ref,
):
    S = s_ref[...]    # (E, N) one-hot sources  (x_j gather)
    T = t_ref[...]    # (E, N) one-hot targets  (x_i gather / scatter-add)
    EF = ef_ref[...]  # (E, Ce) edge features

    def conv(xb, V, kv, qv, wae, We, ba, Wcx, Wca, bc):
        # xb: (N, Cin) node features of the current batch element.
        xv = jnp.dot(xb, V, preferred_element_type=jnp.float32)            # (N, H)
        ee = jnp.dot(EF, We, preferred_element_type=jnp.float32)           # (E, H)
        gate = jax.nn.sigmoid(ee)                                          # (E, H)
        # Fused attention logit (edge part + per-node scalars gathered by S/T).
        e_att = jnp.dot(ee, wae, preferred_element_type=jnp.float32) + ba  # (E, 1)
        a_key = jnp.dot(xv, kv, preferred_element_type=jnp.float32)        # (N, 1)
        a_qry = jnp.dot(xv, qv, preferred_element_type=jnp.float32)        # (N, 1)
        att = jax.nn.sigmoid(
            jnp.dot(T, a_key, preferred_element_type=jnp.float32)
            + jnp.dot(S, a_qry, preferred_element_type=jnp.float32)
            + e_att)                                                        # (E, 1)
        x_j = jnp.dot(S, xv, preferred_element_type=jnp.float32)           # (E, H)
        msg = att * x_j * gate                                              # (E, H)
        # aggr = T^T @ msg without materializing T^T (contract E axis of T).
        aggr = lax.dot_general(
            T, msg, dimension_numbers=(((0,), (0,)), ((), ())),
            preferred_element_type=jnp.float32)                             # (N, H)
        # cat([xv, aggr]) @ Wc + bc == xv @ Wc_x + aggr @ Wc_a + bc
        upd = (jnp.dot(xv, Wcx, preferred_element_type=jnp.float32)
               + jnp.dot(aggr, Wca, preferred_element_type=jnp.float32)
               + bc)                                                        # (N, H)
        return xv + jnp.maximum(upd, 0.0)

    xb = x_ref[0]                                                           # (N, Cin)
    h1 = conv(xb, v1_ref[...], kv1_ref[...], qv1_ref[...], wae1_ref[...],
              we1_ref[...], ba1_ref[...], wcx1_ref[...], wca1_ref[...],
              bc1_ref[...])
    # leaky_relu (skip_connection=False branch), negative_slope=0.01
    h1 = jnp.where(h1 > 0, h1, 0.01 * h1)
    out_ref[0] = conv(h1, v2_ref[...], kv2_ref[...], qv2_ref[...], wae2_ref[...],
                      we2_ref[...], ba2_ref[...], wcx2_ref[...], wca2_ref[...],
                      bc2_ref[...])


def _pad_cols(a, p):
    return jnp.pad(a, ((0, 0), (0, p - a.shape[1])))


def _full_spec(a):
    n = a.ndim
    return pl.BlockSpec(a.shape, lambda b: (0,) * n)


def cluster_my_egnn_net(X, edge_index, edge_weight, params, num_nodes):
    """X: (B, N, Cin) f32; edge_index: (2, E) int32; edge_weight: (E, Ce) f32."""
    B, N, Cin = X.shape
    E, Ce = edge_weight.shape
    H = params["v1"].shape[1]
    out_ch = params["v2"].shape[1]
    P = ((out_ch + 127) // 128) * 128  # lane-dense padded output width

    # Glue: dense one-hot gather/scatter matrices (small static graph here).
    S = jax.nn.one_hot(edge_index[0], num_nodes, dtype=jnp.float32)   # (E, N)
    T = jax.nn.one_hot(edge_index[1], num_nodes, dtype=jnp.float32)   # (E, N)

    # --- layer 1: exact algebraic weight folding ---
    kv1 = params["k1"] @ params["wa1"][:H]               # (H, 1)  K @ Wa_key
    qv1 = params["q1"] @ params["wa1"][H:2 * H]          # (H, 1)  Q @ Wa_query
    wae1 = params["wa1"][2 * H:]                         # (H, 1)
    wcx1 = params["wc1"][:H]                             # (H, H)
    wca1 = params["wc1"][H:]                             # (H, H)

    # --- layer 2: same folding + zero-pad out_ch -> P (padded lanes stay
    #     identically zero; sliced off after the call) ---
    pad_rows = lambda v: jnp.pad(v, ((0, P - out_ch), (0, 0)))
    v2 = _pad_cols(params["v2"], P)                                   # (H, P)
    kv2 = pad_rows(params["k2"] @ params["wa2"][:out_ch])             # (P, 1)
    qv2 = pad_rows(params["q2"] @ params["wa2"][out_ch:2 * out_ch])   # (P, 1)
    wae2 = pad_rows(params["wa2"][2 * out_ch:])                       # (P, 1)
    we2 = _pad_cols(params["we2"], P)                                 # (Ce, P)
    wcx2 = jnp.pad(params["wc2"][:out_ch],
                   ((0, P - out_ch), (0, P - out_ch)))                # (P, P)
    wca2 = jnp.pad(params["wc2"][out_ch:],
                   ((0, P - out_ch), (0, P - out_ch)))                # (P, P)
    bc2 = _pad_cols(params["bc2"], P)                                 # (1, P)

    args = (
        X, S, T, edge_weight,
        params["v1"], kv1, qv1, wae1, params["we1"], params["ba1"],
        wcx1, wca1, params["bc1"],
        v2, kv2, qv2, wae2, we2, params["ba2"], wcx2, wca2, bc2,
    )

    in_specs = [pl.BlockSpec((1, N, Cin), lambda b: (b, 0, 0))]
    in_specs += [_full_spec(a) for a in args[1:]]
    out_specs = pl.BlockSpec((1, N, P), lambda b: (b, 0, 0))

    # Advisory cost estimate (matmul FLOPs + sigmoid transcendentals).
    def layer_flops(cin, h):
        return 2 * (N * cin * h + E * Ce * h + E * h + 2 * N * h
                    + 2 * E * N + 2 * E * N * h + 2 * N * h * h)
    flops = B * (layer_flops(Cin, H) + layer_flops(H, P))
    transcendentals = B * ((E * H + E) + (E * P + E))
    bytes_accessed = 4 * (X.size + B * N * P + sum(int(a.size) for a in args[1:]))

    out = pl.pallas_call(
        egnn_net_kernel,
        out_shape=jax.ShapeDtypeStruct((B, N, P), jnp.float32),
        grid=(B,),
        in_specs=in_specs,
        out_specs=out_specs,
        compiler_params=pltpu.CompilerParams(
            dimension_semantics=("parallel",)),
        cost_estimate=pl.CostEstimate(
            flops=flops, transcendentals=transcendentals,
            bytes_accessed=bytes_accessed),
    )(*args)
    return out[:, :, :out_ch]


# ---------------- pure-JAX reference (unfused, for correctness check) --------
def _conv_ref(X, S, T, EF, V, K, Q, We, Wa, ba, Wc, bc):
    xv = X @ V                                   # (B, N, H)
    ee = EF @ We                                 # (E, H)
    gate = jax.nn.sigmoid(ee)
    x_j = jnp.einsum("en,bnh->beh", S, xv)       # (B, E, H)
    x_i = jnp.einsum("en,bnh->beh", T, xv)
    query = x_j @ Q
    key = x_i @ K
    att_feat = jnp.concatenate(
        [key, query, jnp.broadcast_to(ee, (X.shape[0],) + ee.shape)], axis=-1)
    att = jax.nn.sigmoid(att_feat @ Wa + ba)     # (B, E, 1)
    msg = att * x_j * gate
    aggr = jnp.einsum("ne,beh->bnh", T.T, msg)
    upd = jnp.concatenate([xv, aggr], axis=-1) @ Wc + bc
    return xv + jnp.maximum(upd, 0.0)


def _net_ref(X, edge_index, edge_weight, p, num_nodes):
    S = jax.nn.one_hot(edge_index[0], num_nodes, dtype=jnp.float32)
    T = jax.nn.one_hot(edge_index[1], num_nodes, dtype=jnp.float32)
    h = _conv_ref(X, S, T, edge_weight, p["v1"], p["k1"], p["q1"], p["we1"],
                  p["wa1"], p["ba1"], p["wc1"], p["bc1"])
    h = jnp.where(h > 0, h, 0.01 * h)
    return _conv_ref(h, S, T, edge_weight, p["v2"], p["k2"], p["q2"], p["we2"],
                     p["wa2"], p["ba2"], p["wc2"], p["bc2"])


# ---------------- deterministic parameter init ----------------
def _xavier(key, shape):
    fan_in, fan_out = shape
    bound = (6.0 / (fan_in + fan_out)) ** 0.5
    return jax.random.uniform(key, shape, jnp.float32, -bound, bound)


def init_params(key, in_ch, spatial_ch, out_ch, edge_ch):
    ks = jax.random.split(key, 16)
    p = {}
    # conv1: in_ch -> spatial_ch
    p["v1"] = _xavier(ks[0], (in_ch, spatial_ch))
    p["k1"] = _xavier(ks[1], (spatial_ch, spatial_ch))
    p["q1"] = _xavier(ks[2], (spatial_ch, spatial_ch))
    p["we1"] = _xavier(ks[3], (edge_ch, spatial_ch))
    p["wa1"] = _xavier(ks[4], (3 * spatial_ch, 1))
    p["ba1"] = jax.random.uniform(ks[5], (1, 1), jnp.float32, -0.1, 0.1)
    p["wc1"] = _xavier(ks[6], (2 * spatial_ch, spatial_ch))
    p["bc1"] = jax.random.uniform(ks[7], (1, spatial_ch), jnp.float32, -0.1, 0.1)
    # conv2: spatial_ch -> out_ch   (skip_connection=False)
    p["v2"] = _xavier(ks[8], (spatial_ch, out_ch))
    p["k2"] = _xavier(ks[9], (out_ch, out_ch))
    p["q2"] = _xavier(ks[10], (out_ch, out_ch))
    p["we2"] = _xavier(ks[11], (edge_ch, out_ch))
    p["wa2"] = _xavier(ks[12], (3 * out_ch, 1))
    p["ba2"] = jax.random.uniform(ks[13], (1, 1), jnp.float32, -0.1, 0.1)
    p["wc2"] = _xavier(ks[14], (2 * out_ch, out_ch))
    p["bc2"] = jax.random.uniform(ks[15], (1, out_ch), jnp.float32, -0.1, 0.1)
    return p


if __name__ == "__main__":
    B, N, E = 2, 8, 16
    in_ch, spatial_ch, out_ch, edge_ch = 4, 16, 8, 1

    key = jax.random.PRNGKey(0)
    kx, ke, kw, kp = jax.random.split(key, 4)

    X = jax.random.normal(kx, (B, N, in_ch), jnp.float32)
    edge_index = jax.random.randint(ke, (2, E), 0, N, jnp.int32)
    edge_weight = jax.random.normal(kw, (E, edge_ch), jnp.float32)
    params = init_params(kp, in_ch, spatial_ch, out_ch, edge_ch)

    out = cluster_my_egnn_net(X, edge_index, edge_weight, params, num_nodes=N)
    out = jax.block_until_ready(out)

    ref = _net_ref(X, edge_index, edge_weight, params, num_nodes=N)
    assert out.shape == (B, N, out_ch)
    assert jnp.allclose(out, ref, atol=1e-4, rtol=1e-4), "mismatch vs reference"

    print("KERNEL_OK")
</pallas_src>

<mosaic_0001>
module attributes {stable_mosaic.version = 11 : i64} {
  func.func @egnn_net_kernel(%arg0: i32, %arg1: memref<1x8x4xf32, #tpu.memory_space<vmem>>, %arg2: memref<16x8xf32, #tpu.memory_space<vmem>>, %arg3: memref<16x8xf32, #tpu.memory_space<vmem>>, %arg4: memref<16x1xf32, #tpu.memory_space<vmem>>, %arg5: memref<4x16xf32, #tpu.memory_space<vmem>>, %arg6: memref<16x1xf32, #tpu.memory_space<vmem>>, %arg7: memref<16x1xf32, #tpu.memory_space<vmem>>, %arg8: memref<16x1xf32, #tpu.memory_space<vmem>>, %arg9: memref<1x16xf32, #tpu.memory_space<vmem>>, %arg10: memref<1x1xf32, #tpu.memory_space<vmem>>, %arg11: memref<16x16xf32, #tpu.memory_space<vmem>>, %arg12: memref<16x16xf32, #tpu.memory_space<vmem>>, %arg13: memref<1x16xf32, #tpu.memory_space<vmem>>, %arg14: memref<16x128xf32, #tpu.memory_space<vmem>>, %arg15: memref<128x1xf32, #tpu.memory_space<vmem>>, %arg16: memref<128x1xf32, #tpu.memory_space<vmem>>, %arg17: memref<128x1xf32, #tpu.memory_space<vmem>>, %arg18: memref<1x128xf32, #tpu.memory_space<vmem>>, %arg19: memref<1x1xf32, #tpu.memory_space<vmem>>, %arg20: memref<128x128xf32, #tpu.memory_space<vmem>>, %arg21: memref<128x128xf32, #tpu.memory_space<vmem>>, %arg22: memref<1x128xf32, #tpu.memory_space<vmem>>, %arg23: memref<1x8x128xf32, #tpu.memory_space<vmem>>) attributes {dimension_semantics = [#tpu.dimension_semantics<parallel>], iteration_bounds = array<i64: 2>, scalar_prefetch = 0 : i64, scratch_operands = 0 : i64, tpu.core_type = #tpu.core_type<tc>, window_params = [{transform_indices = @transform_0, window_bounds = array<i64: 1, 8, 4>}, {pipeline_mode = #tpu.pipeline_mode<synchronous>, transform_indices = @transform_1, window_bounds = array<i64: 16, 8>}, {pipeline_mode = #tpu.pipeline_mode<synchronous>, transform_indices = @transform_2, window_bounds = array<i64: 16, 8>}, {pipeline_mode = #tpu.pipeline_mode<synchronous>, transform_indices = @transform_3, window_bounds = array<i64: 16, 1>}, {pipeline_mode = #tpu.pipeline_mode<synchronous>, transform_indices = @transform_4, window_bounds = array<i64: 4, 16>}, {pipeline_mode = #tpu.pipeline_mode<synchronous>, transform_indices = @transform_5, window_bounds = array<i64: 16, 1>}, {pipeline_mode = #tpu.pipeline_mode<synchronous>, transform_indices = @transform_6, window_bounds = array<i64: 16, 1>}, {pipeline_mode = #tpu.pipeline_mode<synchronous>, transform_indices = @transform_7, window_bounds = array<i64: 16, 1>}, {pipeline_mode = #tpu.pipeline_mode<synchronous>, transform_indices = @transform_8, window_bounds = array<i64: 1, 16>}, {pipeline_mode = #tpu.pipeline_mode<synchronous>, transform_indices = @transform_9, window_bounds = array<i64: 1, 1>}, {pipeline_mode = #tpu.pipeline_mode<synchronous>, transform_indices = @transform_10, window_bounds = array<i64: 16, 16>}, {pipeline_mode = #tpu.pipeline_mode<synchronous>, transform_indices = @transform_11, window_bounds = array<i64: 16, 16>}, {pipeline_mode = #tpu.pipeline_mode<synchronous>, transform_indices = @transform_12, window_bounds = array<i64: 1, 16>}, {pipeline_mode = #tpu.pipeline_mode<synchronous>, transform_indices = @transform_13, window_bounds = array<i64: 16, 128>}, {pipeline_mode = #tpu.pipeline_mode<synchronous>, transform_indices = @transform_14, window_bounds = array<i64: 128, 1>}, {pipeline_mode = #tpu.pipeline_mode<synchronous>, transform_indices = @transform_15, window_bounds = array<i64: 128, 1>}, {pipeline_mode = #tpu.pipeline_mode<synchronous>, transform_indices = @transform_16, window_bounds = array<i64: 128, 1>}, {pipeline_mode = #tpu.pipeline_mode<synchronous>, transform_indices = @transform_17, window_bounds = array<i64: 1, 128>}, {pipeline_mode = #tpu.pipeline_mode<synchronous>, transform_indices = @transform_18, window_bounds = array<i64: 1, 1>}, {pipeline_mode = #tpu.pipeline_mode<synchronous>, transform_indices = @transform_19, window_bounds = array<i64: 128, 128>}, {pipeline_mode = #tpu.pipeline_mode<synchronous>, transform_indices = @transform_20, window_bounds = array<i64: 128, 128>}, {pipeline_mode = #tpu.pipeline_mode<synchronous>, transform_indices = @transform_21, window_bounds = array<i64: 1, 128>}, {transform_indices = @transform_22, window_bounds = array<i64: 1, 8, 128>}]} {
    %c0 = arith.constant 0 : index
    %c0_0 = arith.constant 0 : index
    %0 = vector.load %arg2[%c0, %c0_0] : memref<16x8xf32, #tpu.memory_space<vmem>>, vector<16x8xf32>
    %c0_1 = arith.constant 0 : index
    %c0_2 = arith.constant 0 : index
    %1 = vector.load %arg3[%c0_1, %c0_2] : memref<16x8xf32, #tpu.memory_space<vmem>>, vector<16x8xf32>
    %c0_3 = arith.constant 0 : index
    %c0_4 = arith.constant 0 : index
    %2 = vector.load %arg4[%c0_3, %c0_4] : memref<16x1xf32, #tpu.memory_space<vmem>>, vector<16x1xf32>
    %c0_5 = arith.constant 0 : index
    %c0_6 = arith.constant 0 : index
    %c0_7 = arith.constant 0 : index
    %3 = vector.load %arg1[%c0_5, %c0_6, %c0_7] : memref<1x8x4xf32, #tpu.memory_space<vmem>>, vector<1x8x4xf32>
    %4 = vector.shape_cast %3 : vector<1x8x4xf32> to vector<8x4xf32>
    %c0_8 = arith.constant 0 : index
    %c0_9 = arith.constant 0 : index
    %5 = vector.load %arg5[%c0_8, %c0_9] : memref<4x16xf32, #tpu.memory_space<vmem>>, vector<4x16xf32>
    %c0_10 = arith.constant 0 : index
    %c0_11 = arith.constant 0 : index
    %6 = vector.load %arg6[%c0_10, %c0_11] : memref<16x1xf32, #tpu.memory_space<vmem>>, vector<16x1xf32>
    %c0_12 = arith.constant 0 : index
    %c0_13 = arith.constant 0 : index
    %7 = vector.load %arg7[%c0_12, %c0_13] : memref<16x1xf32, #tpu.memory_space<vmem>>, vector<16x1xf32>
    %c0_14 = arith.constant 0 : index
    %c0_15 = arith.constant 0 : index
    %8 = vector.load %arg8[%c0_14, %c0_15] : memref<16x1xf32, #tpu.memory_space<vmem>>, vector<16x1xf32>
    %c0_16 = arith.constant 0 : index
    %c0_17 = arith.constant 0 : index
    %9 = vector.load %arg9[%c0_16, %c0_17] : memref<1x16xf32, #tpu.memory_space<vmem>>, vector<1x16xf32>
    %c0_18 = arith.constant 0 : index
    %c0_19 = arith.constant 0 : index
    %10 = vector.load %arg10[%c0_18, %c0_19] : memref<1x1xf32, #tpu.memory_space<vmem>>, vector<1x1xf32>
    %c0_20 = arith.constant 0 : index
    %c0_21 = arith.constant 0 : index
    %11 = vector.load %arg11[%c0_20, %c0_21] : memref<16x16xf32, #tpu.memory_space<vmem>>, vector<16x16xf32>
    %c0_22 = arith.constant 0 : index
    %c0_23 = arith.constant 0 : index
    %12 = vector.load %arg12[%c0_22, %c0_23] : memref<16x16xf32, #tpu.memory_space<vmem>>, vector<16x16xf32>
    %c0_24 = arith.constant 0 : index
    %c0_25 = arith.constant 0 : index
    %13 = vector.load %arg13[%c0_24, %c0_25] : memref<1x16xf32, #tpu.memory_space<vmem>>, vector<1x16xf32>
    %cst = arith.constant dense<0.000000e+00> : vector<8x16xf32>
    %14 = tpu.matmul %4, %5, %cst {dimension_numbers = #tpu.dot_dimension_numbers<[1], [0], [0], [1], [0, 0, 1, 1], [], []>} : vector<8x4xf32>, vector<4x16xf32>, vector<8x16xf32> -> vector<8x16xf32>
    %cst_26 = arith.constant dense<0.000000e+00> : vector<16x16xf32>
    %15 = tpu.matmul %2, %9, %cst_26 {dimension_numbers = #tpu.dot_dimension_numbers<[1], [0], [0], [1], [0, 0, 1, 1], [], []>} : vector<16x1xf32>, vector<1x16xf32>, vector<16x16xf32> -> vector<16x16xf32>
    %16 = arith.negf %15 : vector<16x16xf32>
    %17 = math.exp %16 : vector<16x16xf32>
    %cst_27 = arith.constant 1.000000e+00 : f32
    %18 = vector.broadcast %cst_27 : f32 to vector<16x16xf32>
    %19 = arith.addf %18, %17 : vector<16x16xf32>
    %20 = arith.divf %18, %19 : vector<16x16xf32>
    %cst_28 = arith.constant dense<0.000000e+00> : vector<16x1xf32>
    %21 = tpu.matmul %15, %8, %cst_28 {dimension_numbers = #tpu.dot_dimension_numbers<[1], [0], [0], [1], [0, 0, 1, 1], [], []>} : vector<16x16xf32>, vector<16x1xf32>, vector<16x1xf32> -> vector<16x1xf32>
    %22 = vector.broadcast %10 : vector<1x1xf32> to vector<16x1xf32>
    %23 = arith.addf %21, %22 : vector<16x1xf32>
    %cst_29 = arith.constant dense<0.000000e+00> : vector<8x1xf32>
    %24 = tpu.matmul %14, %6, %cst_29 {dimension_numbers = #tpu.dot_dimension_numbers<[1], [0], [0], [1], [0, 0, 1, 1], [], []>} : vector<8x16xf32>, vector<16x1xf32>, vector<8x1xf32> -> vector<8x1xf32>
    %cst_30 = arith.constant dense<0.000000e+00> : vector<8x1xf32>
    %25 = tpu.matmul %14, %7, %cst_30 {dimension_numbers = #tpu.dot_dimension_numbers<[1], [0], [0], [1], [0, 0, 1, 1], [], []>} : vector<8x16xf32>, vector<16x1xf32>, vector<8x1xf32> -> vector<8x1xf32>
    %cst_31 = arith.constant dense<0.000000e+00> : vector<16x1xf32>
    %26 = tpu.matmul %1, %24, %cst_31 {dimension_numbers = #tpu.dot_dimension_numbers<[1], [0], [0], [1], [0, 0, 1, 1], [], []>} : vector<16x8xf32>, vector<8x1xf32>, vector<16x1xf32> -> vector<16x1xf32>
    %cst_32 = arith.constant dense<0.000000e+00> : vector<16x1xf32>
    %27 = tpu.matmul %0, %25, %cst_32 {dimension_numbers = #tpu.dot_dimension_numbers<[1], [0], [0], [1], [0, 0, 1, 1], [], []>} : vector<16x8xf32>, vector<8x1xf32>, vector<16x1xf32> -> vector<16x1xf32>
    %28 = arith.addf %26, %27 : vector<16x1xf32>
    %29 = arith.addf %28, %23 : vector<16x1xf32>
    %30 = arith.negf %29 : vector<16x1xf32>
    %31 = math.exp %30 : vector<16x1xf32>
    %cst_33 = arith.constant 1.000000e+00 : f32
    %32 = vector.broadcast %cst_33 : f32 to vector<16x1xf32>
    %33 = arith.addf %32, %31 : vector<16x1xf32>
    %34 = arith.divf %32, %33 : vector<16x1xf32>
    %cst_34 = arith.constant dense<0.000000e+00> : vector<16x16xf32>
    %35 = tpu.matmul %0, %14, %cst_34 {dimension_numbers = #tpu.dot_dimension_numbers<[1], [0], [0], [1], [0, 0, 1, 1], [], []>} : vector<16x8xf32>, vector<8x16xf32>, vector<16x16xf32> -> vector<16x16xf32>
    %36 = vector.broadcast %34 : vector<16x1xf32> to vector<16x16xf32>
    %37 = arith.mulf %36, %35 : vector<16x16xf32>
    %38 = arith.mulf %37, %20 : vector<16x16xf32>
    %cst_35 = arith.constant dense<0.000000e+00> : vector<8x16xf32>
    %39 = tpu.matmul %1, %38, %cst_35 {dimension_numbers = #tpu.dot_dimension_numbers<[0], [0], [1], [1], [0, 1, 1, 1], [], []>} : vector<16x8xf32>, vector<16x16xf32>, vector<8x16xf32> -> vector<8x16xf32>
    %cst_36 = arith.constant dense<0.000000e+00> : vector<8x16xf32>
    %40 = tpu.matmul %14, %11, %cst_36 {dimension_numbers = #tpu.dot_dimension_numbers<[1], [0], [0], [1], [0, 0, 1, 1], [], []>} : vector<8x16xf32>, vector<16x16xf32>, vector<8x16xf32> -> vector<8x16xf32>
    %cst_37 = arith.constant dense<0.000000e+00> : vector<8x16xf32>
    %41 = tpu.matmul %39, %12, %cst_37 {dimension_numbers = #tpu.dot_dimension_numbers<[1], [0], [0], [1], [0, 0, 1, 1], [], []>} : vector<8x16xf32>, vector<16x16xf32>, vector<8x16xf32> -> vector<8x16xf32>
    %42 = arith.addf %40, %41 : vector<8x16xf32>
    %43 = vector.broadcast %13 : vector<1x16xf32> to vector<8x16xf32>
    %44 = arith.addf %42, %43 : vector<8x16xf32>
    %cst_38 = arith.constant 0.000000e+00 : f32
    %45 = vector.broadcast %cst_38 : f32 to vector<8x16xf32>
    %46 = arith.maximumf %44, %45 : vector<8x16xf32>
    %47 = arith.addf %14, %46 : vector<8x16xf32>
    %cst_39 = arith.constant 0.000000e+00 : f32
    %48 = vector.broadcast %cst_39 : f32 to vector<8x16xf32>
    %49 = arith.cmpf ogt, %47, %48 : vector<8x16xf32>
    %cst_40 = arith.constant 0.00999999977 : f32
    %50 = vector.broadcast %cst_40 : f32 to vector<8x16xf32>
    %51 = arith.mulf %50, %47 : vector<8x16xf32>
    %52 = arith.select %49, %47, %51 : vector<8x16xi1>, vector<8x16xf32>
    %c0_41 = arith.constant 0 : index
    %c0_42 = arith.constant 0 : index
    %53 = vector.load %arg14[%c0_41, %c0_42] : memref<16x128xf32, #tpu.memory_space<vmem>>, vector<16x128xf32>
    %c0_43 = arith.constant 0 : index
    %c0_44 = arith.constant 0 : index
    %54 = vector.load %arg15[%c0_43, %c0_44] : memref<128x1xf32, #tpu.memory_space<vmem>>, vector<128x1xf32>
    %c0_45 = arith.constant 0 : index
    %c0_46 = arith.constant 0 : index
    %55 = vector.load %arg16[%c0_45, %c0_46] : memref<128x1xf32, #tpu.memory_space<vmem>>, vector<128x1xf32>
    %c0_47 = arith.constant 0 : index
    %c0_48 = arith.constant 0 : index
    %56 = vector.load %arg17[%c0_47, %c0_48] : memref<128x1xf32, #tpu.memory_space<vmem>>, vector<128x1xf32>
    %c0_49 = arith.constant 0 : index
    %c0_50 = arith.constant 0 : index
    %57 = vector.load %arg18[%c0_49, %c0_50] : memref<1x128xf32, #tpu.memory_space<vmem>>, vector<1x128xf32>
    %c0_51 = arith.constant 0 : index
    %c0_52 = arith.constant 0 : index
    %58 = vector.load %arg19[%c0_51, %c0_52] : memref<1x1xf32, #tpu.memory_space<vmem>>, vector<1x1xf32>
    %c0_53 = arith.constant 0 : index
    %c0_54 = arith.constant 0 : index
    %59 = vector.load %arg20[%c0_53, %c0_54] : memref<128x128xf32, #tpu.memory_space<vmem>>, vector<128x128xf32>
    %c0_55 = arith.constant 0 : index
    %c0_56 = arith.constant 0 : index
    %60 = vector.load %arg21[%c0_55, %c0_56] : memref<128x128xf32, #tpu.memory_space<vmem>>, vector<128x128xf32>
    %c0_57 = arith.constant 0 : index
    %c0_58 = arith.constant 0 : index
    %61 = vector.load %arg22[%c0_57, %c0_58] : memref<1x128xf32, #tpu.memory_space<vmem>>, vector<1x128xf32>
    %cst_59 = arith.constant dense<0.000000e+00> : vector<8x128xf32>
    %62 = tpu.matmul %52, %53, %cst_59 {dimension_numbers = #tpu.dot_dimension_numbers<[1], [0], [0], [1], [0, 0, 1, 1], [], []>} : vector<8x16xf32>, vector<16x128xf32>, vector<8x128xf32> -> vector<8x128xf32>
    %cst_60 = arith.constant dense<0.000000e+00> : vector<16x128xf32>
    %63 = tpu.matmul %2, %57, %cst_60 {dimension_numbers = #tpu.dot_dimension_numbers<[1], [0], [0], [1], [0, 0, 1, 1], [], []>} : vector<16x1xf32>, vector<1x128xf32>, vector<16x128xf32> -> vector<16x128xf32>
    %64 = arith.negf %63 : vector<16x128xf32>
    %65 = math.exp %64 : vector<16x128xf32>
    %cst_61 = arith.constant 1.000000e+00 : f32
    %66 = vector.broadcast %cst_61 : f32 to vector<16x128xf32>
    %67 = arith.addf %66, %65 : vector<16x128xf32>
    %68 = arith.divf %66, %67 : vector<16x128xf32>
    %cst_62 = arith.constant dense<0.000000e+00> : vector<16x1xf32>
    %69 = tpu.matmul %63, %56, %cst_62 {dimension_numbers = #tpu.dot_dimension_numbers<[1], [0], [0], [1], [0, 0, 1, 1], [], []>} : vector<16x128xf32>, vector<128x1xf32>, vector<16x1xf32> -> vector<16x1xf32>
    %70 = vector.broadcast %58 : vector<1x1xf32> to vector<16x1xf32>
    %71 = arith.addf %69, %70 : vector<16x1xf32>
    %cst_63 = arith.constant dense<0.000000e+00> : vector<8x1xf32>
    %72 = tpu.matmul %62, %54, %cst_63 {dimension_numbers = #tpu.dot_dimension_numbers<[1], [0], [0], [1], [0, 0, 1, 1], [], []>} : vector<8x128xf32>, vector<128x1xf32>, vector<8x1xf32> -> vector<8x1xf32>
    %cst_64 = arith.constant dense<0.000000e+00> : vector<8x1xf32>
    %73 = tpu.matmul %62, %55, %cst_64 {dimension_numbers = #tpu.dot_dimension_numbers<[1], [0], [0], [1], [0, 0, 1, 1], [], []>} : vector<8x128xf32>, vector<128x1xf32>, vector<8x1xf32> -> vector<8x1xf32>
    %cst_65 = arith.constant dense<0.000000e+00> : vector<16x1xf32>
    %74 = tpu.matmul %1, %72, %cst_65 {dimension_numbers = #tpu.dot_dimension_numbers<[1], [0], [0], [1], [0, 0, 1, 1], [], []>} : vector<16x8xf32>, vector<8x1xf32>, vector<16x1xf32> -> vector<16x1xf32>
    %cst_66 = arith.constant dense<0.000000e+00> : vector<16x1xf32>
    %75 = tpu.matmul %0, %73, %cst_66 {dimension_numbers = #tpu.dot_dimension_numbers<[1], [0], [0], [1], [0, 0, 1, 1], [], []>} : vector<16x8xf32>, vector<8x1xf32>, vector<16x1xf32> -> vector<16x1xf32>
    %76 = arith.addf %74, %75 : vector<16x1xf32>
    %77 = arith.addf %76, %71 : vector<16x1xf32>
    %78 = arith.negf %77 : vector<16x1xf32>
    %79 = math.exp %78 : vector<16x1xf32>
    %cst_67 = arith.constant 1.000000e+00 : f32
    %80 = vector.broadcast %cst_67 : f32 to vector<16x1xf32>
    %81 = arith.addf %80, %79 : vector<16x1xf32>
    %82 = arith.divf %80, %81 : vector<16x1xf32>
    %cst_68 = arith.constant dense<0.000000e+00> : vector<16x128xf32>
    %83 = tpu.matmul %0, %62, %cst_68 {dimension_numbers = #tpu.dot_dimension_numbers<[1], [0], [0], [1], [0, 0, 1, 1], [], []>} : vector<16x8xf32>, vector<8x128xf32>, vector<16x128xf32> -> vector<16x128xf32>
    %84 = vector.broadcast %82 : vector<16x1xf32> to vector<16x128xf32>
    %85 = arith.mulf %84, %83 : vector<16x128xf32>
    %86 = arith.mulf %85, %68 : vector<16x128xf32>
    %cst_69 = arith.constant dense<0.000000e+00> : vector<8x128xf32>
    %87 = tpu.matmul %1, %86, %cst_69 {dimension_numbers = #tpu.dot_dimension_numbers<[0], [0], [1], [1], [0, 1, 1, 1], [], []>} : vector<16x8xf32>, vector<16x128xf32>, vector<8x128xf32> -> vector<8x128xf32>
    %cst_70 = arith.constant dense<0.000000e+00> : vector<8x128xf32>
    %88 = tpu.matmul %62, %59, %cst_70 {dimension_numbers = #tpu.dot_dimension_numbers<[1], [0], [0], [1], [0, 0, 1, 1], [], []>} : vector<8x128xf32>, vector<128x128xf32>, vector<8x128xf32> -> vector<8x128xf32>
    %cst_71 = arith.constant dense<0.000000e+00> : vector<8x128xf32>
    %89 = tpu.matmul %87, %60, %cst_71 {dimension_numbers = #tpu.dot_dimension_numbers<[1], [0], [0], [1], [0, 0, 1, 1], [], []>} : vector<8x128xf32>, vector<128x128xf32>, vector<8x128xf32> -> vector<8x128xf32>
    %90 = arith.addf %88, %89 : vector<8x128xf32>
    %91 = vector.broadcast %61 : vector<1x128xf32> to vector<8x128xf32>
    %92 = arith.addf %90, %91 : vector<8x128xf32>
    %cst_72 = arith.constant 0.000000e+00 : f32
    %93 = vector.broadcast %cst_72 : f32 to vector<8x128xf32>
    %94 = arith.maximumf %92, %93 : vector<8x128xf32>
    %95 = arith.addf %62, %94 : vector<8x128xf32>
    %c0_73 = arith.constant 0 : index
    %c0_74 = arith.constant 0 : index
    %c0_75 = arith.constant 0 : index
    %96 = vector.load %arg23[%c0_73, %c0_74, %c0_75] : memref<1x8x128xf32, #tpu.memory_space<vmem>>, vector<1x8x128xf32>
    %97 = vector.shape_cast %96 : vector<1x8x128xf32> to vector<8x128xf32>
    %98 = vector.shape_cast %95 : vector<8x128xf32> to vector<1x8x128xf32>
    tpu.vector_store %arg23[%c0_73, %c0_74, %c0_75], %98 {strides = array<i32>} : memref<1x8x128xf32, #tpu.memory_space<vmem>>, vector<1x8x128xf32>,
    return
  }
  func.func @transform_0(%arg0: i32) -> (i32, i32, i32) {
    %c0_i32 = arith.constant 0 : i32
    %c0_i32_0 = arith.constant 0 : i32
    %c0_i32_1 = arith.constant 0 : i32
    return %arg0, %c0_i32, %c0_i32_0 : i32, i32, i32
  }
  func.func @transform_1(%arg0: i32) -> (i32, i32) {
    %c0_i32 = arith.constant 0 : i32
    %c0_i32_0 = arith.constant 0 : i32
    %c0_i32_1 = arith.constant 0 : i32
    return %c0_i32, %c0_i32_0 : i32, i32
  }
  func.func @transform_2(%arg0: i32) -> (i32, i32) {
    %c0_i32 = arith.constant 0 : i32
    %c0_i32_0 = arith.constant 0 : i32
    %c0_i32_1 = arith.constant 0 : i32
    return %c0_i32, %c0_i32_0 : i32, i32
  }
  func.func @transform_3(%arg0: i32) -> (i32, i32) {
    %c0_i32 = arith.constant 0 : i32
    %c0_i32_0 = arith.constant 0 : i32
    %c0_i32_1 = arith.constant 0 : i32
    return %c0_i32, %c0_i32_0 : i32, i32
  }
  func.func @transform_4(%arg0: i32) -> (i32, i32) {
    %c0_i32 = arith.constant 0 : i32
    %c0_i32_0 = arith.constant 0 : i32
    %c0_i32_1 = arith.constant 0 : i32
    return %c0_i32, %c0_i32_0 : i32, i32
  }
  func.func @transform_5(%arg0: i32) -> (i32, i32) {
    %c0_i32 = arith.constant 0 : i32
    %c0_i32_0 = arith.constant 0 : i32
    %c0_i32_1 = arith.constant 0 : i32
    return %c0_i32, %c0_i32_0 : i32, i32
  }
  func.func @transform_6(%arg0: i32) -> (i32, i32) {
    %c0_i32 = arith.constant 0 : i32
    %c0_i32_0 = arith.constant 0 : i32
    %c0_i32_1 = arith.constant 0 : i32
    return %c0_i32, %c0_i32_0 : i32, i32
  }
  func.func @transform_7(%arg0: i32) -> (i32, i32) {
    %c0_i32 = arith.constant 0 : i32
    %c0_i32_0 = arith.constant 0 : i32
    %c0_i32_1 = arith.constant 0 : i32
    return %c0_i32, %c0_i32_0 : i32, i32
  }
  func.func @transform_8(%arg0: i32) -> (i32, i32) {
    %c0_i32 = arith.constant 0 : i32
    %c0_i32_0 = arith.constant 0 : i32
    %c0_i32_1 = arith.constant 0 : i32
    return %c0_i32, %c0_i32_0 : i32, i32
  }
  func.func @transform_9(%arg0: i32) -> (i32, i32) {
    %c0_i32 = arith.constant 0 : i32
    %c0_i32_0 = arith.constant 0 : i32
    %c0_i32_1 = arith.constant 0 : i32
    return %c0_i32, %c0_i32_0 : i32, i32
  }
  func.func @transform_10(%arg0: i32) -> (i32, i32) {
    %c0_i32 = arith.constant 0 : i32
    %c0_i32_0 = arith.constant 0 : i32
    %c0_i32_1 = arith.constant 0 : i32
    return %c0_i32, %c0_i32_0 : i32, i32
  }
  func.func @transform_11(%arg0: i32) -> (i32, i32) {
    %c0_i32 = arith.constant 0 : i32
    %c0_i32_0 = arith.constant 0 : i32
    %c0_i32_1 = arith.constant 0 : i32
    return %c0_i32, %c0_i32_0 : i32, i32
  }
  func.func @transform_12(%arg0: i32) -> (i32, i32) {
    %c0_i32 = arith.constant 0 : i32
    %c0_i32_0 = arith.constant 0 : i32
    %c0_i32_1 = arith.constant 0 : i32
    return %c0_i32, %c0_i32_0 : i32, i32
  }
  func.func @transform_13(%arg0: i32) -> (i32, i32) {
    %c0_i32 = arith.constant 0 : i32
    %c0_i32_0 = arith.constant 0 : i32
    %c0_i32_1 = arith.constant 0 : i32
    return %c0_i32, %c0_i32_0 : i32, i32
  }
  func.func @transform_14(%arg0: i32) -> (i32, i32) {
    %c0_i32 = arith.constant 0 : i32
    %c0_i32_0 = arith.constant 0 : i32
    %c0_i32_1 = arith.constant 0 : i32
    return %c0_i32, %c0_i32_0 : i32, i32
  }
  func.func @transform_15(%arg0: i32) -> (i32, i32) {
    %c0_i32 = arith.constant 0 : i32
    %c0_i32_0 = arith.constant 0 : i32
    %c0_i32_1 = arith.constant 0 : i32
    return %c0_i32, %c0_i32_0 : i32, i32
  }
  func.func @transform_16(%arg0: i32) -> (i32, i32) {
    %c0_i32 = arith.constant 0 : i32
    %c0_i32_0 = arith.constant 0 : i32
    %c0_i32_1 = arith.constant 0 : i32
    return %c0_i32, %c0_i32_0 : i32, i32
  }
  func.func @transform_17(%arg0: i32) -> (i32, i32) {
    %c0_i32 = arith.constant 0 : i32
    %c0_i32_0 = arith.constant 0 : i32
    %c0_i32_1 = arith.constant 0 : i32
    return %c0_i32, %c0_i32_0 : i32, i32
  }
  func.func @transform_18(%arg0: i32) -> (i32, i32) {
    %c0_i32 = arith.constant 0 : i32
    %c0_i32_0 = arith.constant 0 : i32
    %c0_i32_1 = arith.constant 0 : i32
    return %c0_i32, %c0_i32_0 : i32, i32
  }
  func.func @transform_19(%arg0: i32) -> (i32, i32) {
    %c0_i32 = arith.constant 0 : i32
    %c0_i32_0 = arith.constant 0 : i32
    %c0_i32_1 = arith.constant 0 : i32
    return %c0_i32, %c0_i32_0 : i32, i32
  }
  func.func @transform_20(%arg0: i32) -> (i32, i32) {
    %c0_i32 = arith.constant 0 : i32
    %c0_i32_0 = arith.constant 0 : i32
    %c0_i32_1 = arith.constant 0 : i32
    return %c0_i32, %c0_i32_0 : i32, i32
  }
  func.func @transform_21(%arg0: i32) -> (i32, i32) {
    %c0_i32 = arith.constant 0 : i32
    %c0_i32_0 = arith.constant 0 : i32
    %c0_i32_1 = arith.constant 0 : i32
    return %c0_i32, %c0_i32_0 : i32, i32
  }
  func.func @transform_22(%arg0: i32) -> (i32, i32, i32) {
    %c0_i32 = arith.constant 0 : i32
    %c0_i32_0 = arith.constant 0 : i32
    %c0_i32_1 = arith.constant 0 : i32
    return %arg0, %c0_i32, %c0_i32_0 : i32, i32, i32
  }
}

</mosaic_0001>

<bundles_post_ra>
// kernel: tpu_custom_call.1
= control target key start
LH: loop header
LB: loop body
LE: loop exit
PB: predicated region body
PF: predicated region fallthrough
CT: control target
= control target key end

     0   :  { %s2431_s0 = inlined_call_operand.vmem [shape: f32[2,8,4], index: 0, kind: input, shape index: {}]   ;;  %s2432_s1 = inlined_call_operand.vmem [shape: f32[16,8], index: 1, kind: input, shape index: {}]   ;;  %s2433_s2 = inlined_call_operand.vmem [shape: f32[16,8], index: 2, kind: input, shape index: {}]   ;;  %s2434_s3 = inlined_call_operand.vmem [shape: f32[16,1], index: 3, kind: input, shape index: {}]   ;;  %s2435_s4 = inlined_call_operand.vmem [shape: f32[4,16], index: 4, kind: input, shape index: {}]   ;;  %s2436_s5 = inlined_call_operand.vmem [shape: f32[16,1], index: 5, kind: input, shape index: {}]   ;;  %s2437_s6 = inlined_call_operand.vmem [shape: f32[16,1], index: 6, kind: input, shape index: {}]   ;;  %s2438_s7 = inlined_call_operand.vmem [shape: f32[16,1], index: 7, kind: input, shape index: {}]   ;;  %s2439_s8 = inlined_call_operand.vmem [shape: f32[1,16], index: 8, kind: input, shape index: {}]   ;;  %s2440_s9 = inlined_call_operand.<no memory space> [shape: f32[1,1], index: 9, kind: input, shape index: {}]   ;;  %s2441_s10 = inlined_call_operand.vmem [shape: f32[16,16], index: 10, kind: input, shape index: {}]   ;;  %s2442_s11 = inlined_call_operand.vmem [shape: f32[16,16], index: 11, kind: input, shape index: {}]   ;;  %s2443_s12 = inlined_call_operand.vmem [shape: f32[1,16], index: 12, kind: input, shape index: {}]   ;;  %s2444_s13 = inlined_call_operand.vmem [shape: f32[16,128], index: 13, kind: input, shape index: {}]   ;;  %s2445_s14 = inlined_call_operand.vmem [shape: f32[128,1], index: 14, kind: input, shape index: {}]   ;;  %s2446_s15 = inlined_call_operand.vmem [shape: f32[128,1], index: 15, kind: input, shape index: {}]   ;;  %s2447_s16 = inlined_call_operand.vmem [shape: f32[128,1], index: 16, kind: input, shape index: {}]   ;;  %s2448_s17 = inlined_call_operand.vmem [shape: f32[1,128], index: 17, kind: input, shape index: {}]   ;;  %s2449_s19 = inlined_call_operand.vmem [shape: f32[128,128], index: 19, kind: input, shape index: {}]   ;;  %s2450_s20 = inlined_call_operand.vmem [shape: f32[128,128], index: 20, kind: input, shape index: {}]   ;;  %s2451_s21 = inlined_call_operand.vmem [shape: f32[1,128], index: 21, kind: input, shape index: {}]   ;;  %s2452_s22 = inlined_call_operand.hbm [shape: f32[2,8,128], index: 22, kind: output, shape index: {}]   ;;  %s2453_s18 = inlined_call_operand.<no memory space> [shape: f32[1,1], index: 18, kind: input, shape index: {}]  }
   0x1   :  { %2464 = sst [smem:[#allocation10_spill]] %s2431_s0  ;;  %v27_v0 = vstv %s2440_s9  ;;  %v29_v1 = vstv %s2453_s18 }
   0x2   :  { %2465 = sst [smem:[#allocation11_spill]] %s2432_s1  ;;  %28 = vst [vmem:[#allocation2] sm:$0x1] %v27_v0 }
   0x3   :  { %2466 = sst [smem:[#allocation12_spill]] %s2433_s2  ;;  %30 = vst [vmem:[#allocation3] sm:$0x1] %v29_v1 }
   0x4   :  { %2467 = sst [smem:[#allocation13_spill]] %s2434_s3 }
   0x5   :  { %2468 = sst [smem:[#allocation14_spill]] %s2435_s4 }
   0x6   :  { %2469 = sst [smem:[#allocation15_spill]] %s2436_s5 }
   0x7   :  { %2470 = sst [smem:[#allocation16_spill]] %s2437_s6 }
   0x8   :  { %2471 = sst [smem:[#allocation17_spill]] %s2438_s7 }
   0x9   :  { %2472 = sst [smem:[#allocation18_spill]] %s2439_s8 }
   0xa   :  { %2473 = sst [smem:[#allocation19_spill]] %s2441_s10 }
   0xb   :  { %31 = vsyncpa [#allocation5], 0 }
   0xc   :  { %33 = vsyncpa [#allocation5 + $0x1], 0  ;;  %s1940_s4 = smov 0   ;;  %s1942_s0 = smov 0  }
   0xd   :  { %s1944_s23 = smov 0   ;;  %s1946_s1 = smov 0  }
   0xe LB: > { %2474 = sst [smem:[#allocation7_spill]] %s1812_s23  ;;  %s1961_s9 = sadd.s32 4294967295, %s1816_s1   ;;  %s1816_s1 = sphi %s1946_s1, %s2491_s1   ;;  %s1812_s23 = sphi %s1944_s23, %s2493_s23   ;;  %s1808_s0 = sphi %s1942_s0, %s2495_s0   ;;  %s1804_s4 = sphi %s1940_s4, %s2494_s4  }
   0xf   : > { %s1626_s18 = sadd.s32 4294967294, %s1816_s1   ;;  %s1965_s5 = sadd.s32 1, %s1816_s1  }
  0x10   : > { %2475 = sst [smem:[#allocation8_spill]] %s1965_s5  ;;  %s513_s24 = sadd.s32 1, %s1812_s23 }
  0x11   : > { %s510_s6 = ssub.s32 %s1816_s1, %s1965_s5  ;;  %p523_p0 = scmp.ne.s32.totalorder %s1812_s23, %s1808_s0 }
  0x12   : > { %p511_p1 = scmp.eq.s32.totalorder %s510_s6, 0  ;;  %p524_p2 = scmp.eq.s32.totalorder %s1961_s9, 1 }
  0x13   : > { %p529_p3 = scmp.ne.s32.totalorder %s1808_s0, %s1804_s4  ;;  %p530_p4 = scmp.eq.s32.totalorder %s1626_s18, 1 }
  0x14   : > { %s1976_s25 = scalar_select %p511_p1, %s1812_s23, %s513_s24  }
  0x15   : > { %p1978_p5 = por %p524_p2, %p523_p0  ;;  %p1982_p6 = por %p530_p4, %p529_p3 }
  0x16   : > { %2476 = sst [smem:[#allocation9_spill]] %s1976_s25  ;;  %p1629_p7 = scmp.ge.s32.totalorder %s1816_s1, 1 }
  0x17   : > { %p618_p8 = scmp.lt.s32.totalorder %s1816_s1, 3 }
  0x19   : > { %p619_p9 = pnand %p1629_p7, %p618_p8 }
  0x1a   : > { %s2479_s8 = sld [smem:[#allocation18_spill]] (!%p619_p9)  ;;  %p679_p10 = scmp.lt.s32.totalorder (!%p619_p9), %s1961_s9, 1 }
  0x1b   : > { %622 = sbr.rel (%p619_p9) target bundleno = 1686 (0x696), region = 108  ;;  %s2480_s30 = sld [smem:[#allocation13_spill]] (!%p619_p9) }
  0x1c   : > { %s2481_s6 = sld [smem:[#allocation14_spill]] (!%p619_p9) }
  0x1d   : > { %s2482_s7 = sld [smem:[#allocation17_spill]] (!%p619_p9) }
  0x1e   : > { %s2483_s23 = sld [smem:[#allocation10_spill]] (!%p619_p9) }
  0x1f   : > { %s2485_s18 = sld [smem:[#allocation15_spill]] (!%p619_p9) }
  0x20   : > { %v697_v2 = vld [vmem:[%s2479_s8] sm:$0x1]  ;;  %vm739_vm0 = vcmask 1040384   ;;  %vm732_vm1 = vcmask 7168   ;;  %vm708_vm2 = vcmask 1043456   ;;  %s680_s3 = scalar_select %p679_p10, %s1961_s9, 1 }
  0x21   : > { %v1994_v3 = vld [vmem:[%s2480_s30] sm:$0xff]  ;;  %1634 = vmatpush.msk.msra.mxu1 %vm739_vm0, %v697_v2  ;;  %vm704_vm3 = vcmask 31744   ;;  %v2013_v7 = vld [vmem:[%s2480_s30 + $0x8] sm:$0xff]  ;;  %s2484_s8 = sld [smem:[#allocation16_spill]]  ;;  %vm807_vm4 = vcmask 130048   ;;  %vm880_vm5 = vcmask 64512  }
  0x22   : > { %v690_v4 = vld [vmem:[%s2481_s6] sm:$0xf]  ;;  %1635 = vmatmul.msk.f32.vlgmr.msra.gmra.mxu1 %vm732_vm1, %v1994_v3  ;;  %s1631_s28 = sshll.u32 %s680_s3, 3  ;;  %s2486_s3 = sld [smem:[#allocation11_spill]]  ;;  %v1818_v25 = vmov 0  }
  0x23   : > { %v696_v5 = vld [vmem:[%s2482_s7 + $0x8] sm:$0xff]  ;;  %1632 = vmatpush.msk.msra.mxu0 %vm708_vm2, %v690_v4  ;;  %v695_v8 = vld [vmem:[%s2482_s7] sm:$0xff]  ;;  %s2487_s24 = sld [smem:[#allocation12_spill]]  ;;  %1716 = vset.pattern.permute.xlu0 %v1818_v25  ;;  %s676_s7 = sand.u32 1, %s1808_s0  }
  0x24   : > { %828 = vmatpush.msra.mxu2 %v696_v5  ;;  %1673 = vmatpush.msra.mxu3 %v696_v5  ;;  %s682_s5 = scalar_lea.vmem %s2483_s23, %s1631_s28  ;;  %s2488_s10 = sld [smem:[#allocation19_spill]]  ;;  %v1718_v26 = vld [vmem:[#allocation2] ss:$0 sm:$0xff] }
  0x25   : > { %v689_v6 = vld [vmem:[%s682_s5] sm:$0xff]  ;;  %v692_v11 = vld [vmem:[%s2485_s18 + $0x8] sm:$0xff]  ;;  %1717 = vset.pattern.permute.xlu2 %v1818_v25  ;;  %s1630_s23 = sshll.u32 %s676_s7, 3  ;;  %s1670_s5 = sshll.u32 %s1961_s9, 3 }
  0x26   : > { %1633 = vmatmul.msk.f32.vlgmr.msra.gmra.mxu0 %vm704_vm3, %v689_v6  ;;  %829 = vmatpush.msra.mxu2 %v695_v8  ;;  %v691_v12 = vld [vmem:[%s2485_s18] sm:$0xff]  ;;  %s1562_s25 = scalar_lea.hbm %s2452_s22, %s1670_s5  ;;  %s678_s6 = scalar_lea.vmem [#allocation4], %s1630_s23 }
  0x27   : > { %1674 = vmatpush.msra.mxu3 %v695_v8  ;;  %v694_v9 = vld [vmem:[%s2484_s8 + $0x8] sm:$0xff]  ;;  %v693_v10 = vld [vmem:[%s2484_s8] sm:$0xff]  ;;  %s1564_s27 = sshll.u32 %s678_s6, 4  ;;  %s1552_s9 = scalar_lea.sflag [#allocation5], %s676_s7  ;;  %s1565_s27 = int_to_ptr.vmem [resolvable:$true] %s1564_s27 }
  0x28   : > { %874 = vmatpush.msrb.mxu0 %v694_v9  ;;  %v2050_v16 = vld [vmem:[%s2486_s3] sm:$0xff]  ;;  %v2057_v17 = vld [vmem:[%s2486_s3 + $0x8] sm:$0xff]  ;;  %s1774_s23 = scalar_lea.hbm %s2452_s22, 16 }
  0x29   : > { %854 = vmatpush.msrb.mxu3 %v692_v11  ;;  %v2064_v18 = vld [vmem:[%s2487_s24] sm:$0xff]  ;;  %v2070_v19 = vld [vmem:[%s2487_s24 + $0x8] sm:$0xff] }
  0x2a   : > { %1636 = vmatmul.msk.f32.gmra.mxu1 %vm732_vm1, %v2013_v7  ;;  %875 = vmatpush.msrb.mxu0 %v693_v10  ;;  %v700_v21 = vld [vmem:[%s2488_s10 + $0x8] sm:$0xff]  ;;  %v699_v22 = vld [vmem:[%s2488_s10] sm:$0xff]  ;;  %s1566_s10 = sshll.u32 %s1562_s25, 4  ;;  %s1567_s10 = int_to_ptr.hbm [resolvable:$true] %s1566_s10 }
  0x2b   : > { %855 = vmatpush.msrb.mxu3 %v691_v12  ;;  %1016 = vxpose.xlu1.b32.start [1/2] (short) (narrow) %v2064_v18, 8  ;;  %s1768_s28 = sshra.s32 %s1567_s10, 4  ;;  %s1769_s28 = int_to_ptr.hbm [resolvable:$true] %s1768_s28 }
  0x2c   : > { %s1770_s8 = scalar_lea.hbm %s1769_s28, 8  ;;  %p1775_p0 = scmp.lt.s32.totalorder %s1769_s28, %s2452_s22 }
  0x2d   : > { %p1771_p11 = scmp.ne.s32.totalorder %s1769_s28, %s1770_s8  ;;  %p1776_p1 = scmp.lt.s32.totalorder %s1774_s23, %s1770_s8 }
  0x2f   : > { %p1772_p12 = pnand %p1771_p11, %p1978_p5  ;;  %p1777_p2 = por %p1776_p1, %p1775_p0 }
  0x31   : > { %p1773_p13 = pneg %p1772_p12 }
  0x33   : > { %1017 = vxpose.xlu1.b32.end [2/2] (short) (narrow) %v2070_v19, 8  ;;  %p1778_p3 = pnand %p1777_p2, %p1773_p13 }
  0x9f   : > { %v2032_v13 = vpop.f32.mrf.mxu1 }
  0xa0   : > { %1639 = vmatmul.msk.f32.vlgmr.msra.gmra.mxu2 %vm807_vm4, %v2032_v13  ;;  %v1637_v1 = vmul.f32 -1.442695, %v2032_v13 }
  0xa3   : > { %v2036_v14 = vpop.f32.mrf.mxu0 }
  0xa4   : > { %1642 = vmatmul.msk.f32.vlgmr.msrb.gmra.mxu0 %vm807_vm4, %v2036_v14  ;;  %994 = vmatpush.msrb.mxu1 %v2036_v14 }
  0xa5   : > { %1649 = vmatmul.msk.f32.vlgmr.msrb.gmra.mxu1 %vm880_vm5, %v2050_v16 }
  0xa7   : > { %v2041_v15 = vpop.f32.mrf.mxu1 }
  0xa8   : > { %1640 = vmatmul.msk.f32.vlgmr.msra.gmra.mxu3 %vm807_vm4, %v2041_v15  ;;  %v1638_v0 = vmul.f32 -1.442695, %v2041_v15 }
  0xad   : > { %1650 = vmatmul.msk.f32.gmra.mxu1 %vm880_vm5, %v2057_v17 }
  0xb0   : > { %1641 = vmatmul.msk.f32.vlgmr.msrb.gmra.mxu3 %vm807_vm4, %v2036_v14 }
 0x121   : > { %v877_v20 = vpop.f32.mrf.mxu0 }
 0x122   : > { %902 = vmatpush.msra.mxu3 %v877_v20  ;;  %v996_v12 = vpop.f32.mrf.mxu1 }
 0x123   : > { %1643 = vmatmul.msk.f32.vlgmr.msra.gmra.mxu3 %vm880_vm5, %v2050_v16  ;;  %v831_v27 = vpop.f32.mrf.mxu2 }
 0x124   : > { %1108 = vmatpush.msrb.mxu3 %v700_v21  ;;  %v832_v30 = vadd.f32 %v1718_v26, %v831_v27 }
 0x126   : > { %1109 = vmatpush.msrb.mxu3 %v699_v22 }
 0x12b   : > { %v834_v23 = vpop.f32.mrf.mxu3  ;;  %1644 = vmatmul.msk.f32.gmra.mxu3 %vm880_vm5, %v2057_v17 }
 0x12c   : > { %v835_v36 = vadd.f32 %v1718_v26, %v834_v23 }
 0x133   : > { %v857_v24 = vpop.f32.mrf.mxu3  ;;  %1653 = vmatmul.msk.f32.vlgmr.msrb.gmra.mxu3 %vm807_vm4, %v2036_v14 }
 0x134   : > { %931 = vmatpush.msra.mxu0 %v857_v24  ;;  %v999_v24 = vpop.f32.mrf.mxu1 }
 0x135   : > { %1645 = vmatmul.msk.f32.vlgmr.msra.gmra.mxu0 %vm880_vm5, %v2064_v18 }
 0x13d   : > { %1646 = vmatmul.msk.f32.gmra.mxu0 %vm880_vm5, %v2070_v19 }
 0x1a6   : > { %v904_v28 = vpop.f32.mrf.mxu3 }
 0x1ae   : > { %v907_v34 = vpop.f32.mrf.mxu3 }
 0x1b2   : > { %v933_v29 = vpop.f32.mrf.mxu0 }
 0x1b3   : > { %v934_v31 = vadd.f32 %v933_v29, %v904_v28 }
 0x1b5   : > { %v939_v32 = vadd.f32 %v934_v31, %v832_v30 }
 0x1b7   : > { %v1647_v33 = vmul.f32 -1.442695, %v939_v32 }
 0x1b9   : > { %1722 = vpow2.f32 %v1647_v33 }
 0x1ba   : > { %v936_v35 = vpop.f32.mrf.mxu0 }
 0x1bb   : > { %v937_v37 = vadd.f32 %v936_v35, %v907_v34 }
 0x1bd   : > { %v940_v38 = vadd.f32 %v937_v37, %v835_v36 }
 0x1bf   : > { %v1723_v39 = vpop.eup %1722  ;;  %v1648_v40 = vmul.f32 -1.442695, %v940_v38 }
 0x1c0   : > { %v947_v41 = vadd.f32 1.0, %v1723_v39 }
 0x1c1   : > { %1724 = vpow2.f32 %v1648_v40  ;;  %v2091_v40 = vpop.trf.xlu1 }
 0x1c2   : > { %1726 = vrcp.f32 %v947_v41  ;;  %v960_v59 = vand.u32 2147483648, %v947_v41  ;;  %vm954_vm11 = vweird.f32 %v947_v41  ;;  %v958_v60 = vand.u32 2147483647, %v947_v41 }
 0x1c4   : > { %v961_v62 = vor.u32 1.1754944e-38, %v960_v59  ;;  %vm959_vm13 = vcmp.eq.f32.partialorder %v958_v60, 8.507059e+37  ;;  %v1132_v59 = vld [vmem:[%s2445_s14 + $0x38] sm:$0xff] }
 0x1c7   : > { %v1725_v42 = vpop.eup %1724 }
 0x1c8   : > { %v948_v43 = vadd.f32 1.0, %v1725_v42  ;;  %v1727_v44 = vpop.eup %1726  ;;  %v702_v42 = vld [vmem:[%s2442_s11 + $0x8] sm:$0xff] }
 0x1c9   : > { %v950_v45 = vmul.f32 %v1727_v44, %v947_v41  ;;  %vm955_vm10 = vweird.f32 %v1727_v44 }
 0x1ca   : > { %1728 = vrcp.f32 %v948_v43  ;;  %v975_v50 = vand.u32 2147483648, %v948_v43  ;;  %v973_v52 = vand.u32 2147483647, %v948_v43  ;;  %vm969_vm7 = vweird.f32 %v948_v43  ;;  %vm956_vm12 = vmor %vm954_vm11, %vm955_vm10 }
 0x1cb   : > { %v951_v49 = vsub.f32 1.0, %v950_v45  ;;  %1730 = vpow2.f32 %v1638_v0  ;;  %v1124_v45 = vld [vmem:[%s2444_s13 + $0x8] sm:$0xff] }
 0x1cc   : > { %v976_v55 = vor.u32 1.1754944e-38, %v975_v50  ;;  %vm974_vm9 = vcmp.eq.f32.partialorder %v973_v52, 8.507059e+37  ;;  %1732 = vpow2.f32 %v1637_v1  ;;  %1225 = vmatpush.msrb.mxu0 %v1124_v45  ;;  %v1138_v50 = vld [vmem:[%s2445_s14 + $0x68] sm:$0xff]  ;;  %v1136_v52 = vld [vmem:[%s2445_s14 + $0x58] sm:$0xff]  ;;  %v1129_v1 = vld [vmem:[%s2445_s14 + $0x20] sm:$0xff] }
 0x1cd   : > { %v952_v54 = vmul.f32 %v1727_v44, %v951_v49  ;;  %v1139_v49 = vld [vmem:[%s2445_s14 + $0x70] sm:$0xff]  ;;  %v1157_v45 = vld [vmem:[%s2447_s16] sm:$0xff] }
 0x1cf   : > { %v953_v58 = vadd.f32 %v1727_v44, %v952_v54  ;;  %v1134_v54 = vld [vmem:[%s2445_s14 + $0x48] sm:$0xff] }
 0x1d0   : > { %v1729_v46 = vpop.eup %1728 }
 0x1d1   : > { %v965_v47 = vmul.f32 %v1729_v46, %v948_v43  ;;  %vm970_vm6 = vweird.f32 %v1729_v46  ;;  %v957_v61 = vsel %vm956_vm12, %v1727_v44, %v953_v58  ;;  %v1731_v2 = vpop.eup %1730  ;;  %v701_v43 = vld [vmem:[%s2442_s11] sm:$0xff] }
 0x1d2   : > { %vm971_vm8 = vmor %vm969_vm7, %vm970_vm6  ;;  %v962_v63 = vsel %vm959_vm13, %v961_v62, %v957_v61  ;;  %v773_v4 = vadd.f32 1.0, %v1731_v2  ;;  %v1733_v5 = vpop.eup %1732  ;;  %v1131_v61 = vld [vmem:[%s2445_s14 + $0x30] sm:$0xff] }
 0x1d3   : > { %v966_v48 = vsub.f32 1.0, %v965_v47  ;;  %v772_v6 = vadd.f32 1.0, %v1733_v5  ;;  %v1173_v47 = vld [vmem:[%s2448_s17] sm:$0x1] }
 0x1d4   : > { %1734 = vrcp.f32 %v773_v4  ;;  %v800_v23 = vand.u32 2147483648, %v773_v4  ;;  %vm794_vm15 = vweird.f32 %v773_v4  ;;  %v798_v13 = vand.u32 2147483647, %v773_v4 }
 0x1d5   : > { %v967_v51 = vmul.f32 %v1729_v46, %v966_v48  ;;  %1736 = vrcp.f32 %v772_v6  ;;  %v785_v33 = vand.u32 2147483648, %v772_v6  ;;  %vm779_vm7 = vweird.f32 %v772_v6  ;;  %v1140_v48 = vld [vmem:[%s2445_s14 + $0x78] sm:$0xff] }
 0x1d6   : > { %v801_v28 = vor.u32 1.1754944e-38, %v800_v23  ;;  %vm799_vm3 = vcmp.eq.f32.partialorder %v798_v13, 8.507059e+37  ;;  %v783_v34 = vand.u32 2147483647, %v772_v6  ;;  %1321 = vmatpush.msra.mxu3 %v1140_v48  ;;  %v1148_v23 = vld [vmem:[%s2446_s15 + $0x38] sm:$0xff]  ;;  %v1146_v13 = vld [vmem:[%s2446_s15 + $0x28] sm:$0xff] }
 0x1d7   : > { %v968_v53 = vadd.f32 %v1729_v46, %v967_v51  ;;  %v786_v37 = vor.u32 1.1754944e-38, %v785_v33  ;;  %v1137_v51 = vld [vmem:[%s2445_s14 + $0x60] sm:$0xff]  ;;  %v1168_v33 = vld [vmem:[%s2447_s16 + $0x58] sm:$0xff] }
 0x1d8   : > { %1322 = vmatpush.msra.mxu3 %v1139_v49 }
 0x1d9   : > { %v972_v56 = vsel %vm971_vm8, %v1729_v46, %v968_v53  ;;  %v1123_v46 = vld [vmem:[%s2444_s13] sm:$0xff]  ;;  %v1135_v53 = vld [vmem:[%s2445_s14 + $0x50] sm:$0xff] }
 0x1da   : > { %v977_v57 = vsel %vm974_vm9, %v976_v55, %v972_v56  ;;  %v1735_v8 = vpop.eup %1734  ;;  %vm784_vm9 = vcmp.eq.f32.partialorder %v783_v34, 8.507059e+37  ;;  %1226 = vmatpush.msrb.mxu0 %v1123_v46  ;;  %1323 = vmatpush.msra.mxu3 %v1138_v50  ;;  %v1133_v55 = vld [vmem:[%s2445_s14 + $0x40] sm:$0xff]  ;;  %v1167_v34 = vld [vmem:[%s2447_s16 + $0x50] sm:$0xff]  ;;  %v1190_v50 = vld [vmem:[%s2449_s19 + $0x78] sm:$0xff] }
 0x1db   : > { %1009 = vperm.xlu0 %1716, %v977_v57   ;;  %v790_v9 = vmul.f32 %v1735_v8, %v773_v4  ;;  %v1737_v11 = vpop.eup %1736  ;;  %vm795_vm14 = vweird.f32 %v1735_v8  ;;  %v1719_v56 = vld [vmem:[%s2443_s12] ss:$0 sm:$0xff]  ;;  %v1111_v57 = vpop.f32.mrf.mxu3  ;;  %v1128_v4 = vld [vmem:[%s2445_s14 + $0x18] sm:$0xff] }
 0x1dc   : > { %v775_v21 = vmul.f32 %v1737_v11, %v772_v6  ;;  %vm796_vm2 = vmor %vm794_vm15, %vm795_vm14  ;;  %vm780_vm6 = vweird.f32 %v1737_v11  ;;  %1655 = vmatpush.msk.msra.mxu0 %vm739_vm0, %v1173_v47  ;;  %1324 = vmatpush.msra.mxu3 %v1137_v51  ;;  %v1156_v6 = vld [vmem:[%s2446_s15 + $0x78] sm:$0xff] }
 0x1dd   : > { %v791_v10 = vsub.f32 1.0, %v790_v9  ;;  %vm781_vm8 = vmor %vm779_vm7, %vm780_vm6 }
 0x1de   : > { %v776_v15 = vsub.f32 1.0, %v775_v21  ;;  %1325 = vmatpush.msra.mxu3 %v1136_v52  ;;  %v1151_v21 = vld [vmem:[%s2446_s15 + $0x50] sm:$0xff] }
 0x1df   : > { %v792_v20 = vmul.f32 %v1735_v8, %v791_v10  ;;  %v1126_v10 = vld [vmem:[%s2445_s14 + $0x8] sm:$0xff]  ;;  %v1189_v52 = vld [vmem:[%s2449_s19 + $0x70] sm:$0xff] }
 0x1e0   : > { %v777_v26 = vmul.f32 %v1737_v11, %v776_v15  ;;  %1326 = vmatpush.msra.mxu3 %v1135_v53  ;;  %v1149_v15 = vld [vmem:[%s2446_s15 + $0x40] sm:$0xff]  ;;  %v1188_v53 = vld [vmem:[%s2449_s19 + $0x68] sm:$0xff] }
 0x1e1   : > { %v793_v22 = vadd.f32 %v1735_v8, %v792_v20  ;;  %v1152_v20 = vld [vmem:[%s2446_s15 + $0x58] sm:$0xff] }
 0x1e2   : > { %v778_v32 = vadd.f32 %v1737_v11, %v777_v26  ;;  %1327 = vmatpush.msra.mxu3 %v1134_v54  ;;  %v1142_v26 = vld [vmem:[%s2446_s15 + $0x8] sm:$0xff]  ;;  %v1186_v54 = vld [vmem:[%s2449_s19 + $0x58] sm:$0xff] }
 0x1e3   : > { %1004 = vperm.xlu0 %1716, %v962_v63   ;;  %v797_v25 = vsel %vm796_vm2, %v1735_v8, %v793_v22  ;;  %v1130_v63 = vld [vmem:[%s2445_s14 + $0x28] sm:$0xff]  ;;  %v1127_v8 = vld [vmem:[%s2445_s14 + $0x10] sm:$0xff] }
 0x1e4   : > { %v802_v30 = vsel %vm799_vm3, %v801_v28, %v797_v25  ;;  %v782_v35 = vsel %vm781_vm8, %v1737_v11, %v778_v32  ;;  %1328 = vmatpush.msra.mxu3 %v1133_v55  ;;  %v1154_v11 = vld [vmem:[%s2446_s15 + $0x68] sm:$0xff]  ;;  %v1144_v25 = vld [vmem:[%s2446_s15 + $0x18] sm:$0xff]  ;;  %v1141_v28 = vld [vmem:[%s2446_s15] sm:$0xff] }
 0x1e5   : > { %v787_v39 = vsel %vm784_vm9, %v786_v37, %v782_v35  ;;  %v1150_v22 = vld [vmem:[%s2446_s15 + $0x48] sm:$0xff]  ;;  %v1169_v32 = vld [vmem:[%s2447_s16 + $0x60] sm:$0xff]  ;;  %v1164_v37 = vld [vmem:[%s2447_s16 + $0x38] sm:$0xff] }
 0x1e6   : > { %1329 = vmatpush.msra.mxu3 %v1132_v59  ;;  %v1166_v35 = vld [vmem:[%s2447_s16 + $0x48] sm:$0xff]  ;;  %v1185_v55 = vld [vmem:[%s2449_s19 + $0x50] sm:$0xff]  ;;  %v1179_v59 = vld [vmem:[%s2449_s19 + $0x20] sm:$0xff] }
 0x1e8   : > { %1330 = vmatpush.msra.mxu3 %v1131_v61  ;;  %v1177_v61 = vld [vmem:[%s2449_s19 + $0x10] sm:$0xff] }
 0x1ea   : > { %1331 = vmatpush.msra.mxu3 %v1130_v63 }
 0x1ec   : > { %1332 = vmatpush.msra.mxu3 %v1129_v1 }
 0x1ee   : > { %1333 = vmatpush.msra.mxu3 %v1128_v4 }
 0x1f0   : > { %1334 = vmatpush.msra.mxu3 %v1127_v8 }
 0x1f2   : > { %1335 = vmatpush.msra.mxu3 %v1126_v10 }
 0x24d   : > { %v1010_v27 = vpop.permute.xlu0 %1009 }
 0x24e   : > { %v1013_v29 = vmul.f32 %v1010_v27, %v999_v24  ;;  %v1145_v24 = vld [vmem:[%s2446_s15 + $0x20] sm:$0xff] }
 0x24f   : > { %v1125_v27 = vld [vmem:[%s2445_s14] sm:$0xff] }
 0x250   : > { %v1015_v31 = vmul.f32 %v1013_v29, %v802_v30  ;;  %1336 = vmatpush.msra.mxu3 %v1125_v27  ;;  %v1172_v29 = vld [vmem:[%s2447_s16 + $0x78] sm:$0xff]  ;;  %v1171_v30 = vld [vmem:[%s2447_s16 + $0x70] sm:$0xff] }
 0x252   : > { %1065 = vmatpush.msrb.mxu2 %v1015_v31  ;;  %v1170_v31 = vld [vmem:[%s2447_s16 + $0x68] sm:$0xff] }
 0x255   : > { %v1005_v36 = vpop.permute.xlu0 %1004 }
 0x256   : > { %v1012_v38 = vmul.f32 %v1005_v36, %v996_v12  ;;  %v1153_v12 = vld [vmem:[%s2446_s15 + $0x60] sm:$0xff] }
 0x257   : > { %v1165_v36 = vld [vmem:[%s2447_s16 + $0x40] sm:$0xff] }
 0x258   : > { %v1014_v41 = vmul.f32 %v1012_v38, %v787_v39  ;;  %v1163_v38 = vld [vmem:[%s2447_s16 + $0x30] sm:$0xff]  ;;  %v1162_v39 = vld [vmem:[%s2447_s16 + $0x28] sm:$0xff] }
 0x25a   : > { %1066 = vmatpush.msrb.mxu2 %v1014_v41  ;;  %v1161_v41 = vld [vmem:[%s2447_s16 + $0x20] sm:$0xff] }
 0x25b   : > { %1651 = vmatmul.msk.f32.vlgmr.msrb.gmra.mxu2 %vm807_vm4, %v2091_v40 }
 0x25c   : > { %1088 = vmatpush.msra.mxu2 %v702_v42  ;;  %v1160_v42 = vld [vmem:[%s2447_s16 + $0x18] sm:$0xff] }
 0x25e   : > { %1089 = vmatpush.msra.mxu2 %v701_v43  ;;  %v1159_v43 = vld [vmem:[%s2447_s16 + $0x10] sm:$0xff] }
 0x260   : > { %1298 = vmatpush.msrb.mxu2 %v1172_v29 }
 0x262   : > { %1299 = vmatpush.msrb.mxu2 %v1171_v30 }
 0x264   : > { %1300 = vmatpush.msrb.mxu2 %v1170_v31 }
 0x266   : > { %1301 = vmatpush.msrb.mxu2 %v1169_v32 }
 0x268   : > { %1302 = vmatpush.msrb.mxu2 %v1168_v33 }
 0x26a   : > { %1303 = vmatpush.msrb.mxu2 %v1167_v34 }
 0x26c   : > { %1304 = vmatpush.msrb.mxu2 %v1166_v35 }
 0x26e   : > { %1305 = vmatpush.msrb.mxu2 %v1165_v36 }
 0x270   : > { %1306 = vmatpush.msrb.mxu2 %v1164_v37 }
 0x272   : > { %1307 = vmatpush.msrb.mxu2 %v1163_v38 }
 0x274   : > { %1308 = vmatpush.msrb.mxu2 %v1162_v39 }
 0x276   : > { %1309 = vmatpush.msrb.mxu2 %v1161_v41 }
 0x278   : > { %1310 = vmatpush.msrb.mxu2 %v1160_v42 }
 0x27a   : > { %1311 = vmatpush.msrb.mxu2 %v1159_v43 }
 0x2de   : > { %v1068_v44 = vpop.f32.mrf.mxu2 }
 0x2df   : > { %1652 = vmatmul.msk.f32.vlgmr.msra.gmra.mxu2 %vm807_vm4, %v1068_v44  ;;  %v1158_v44 = vld [vmem:[%s2447_s16 + $0x8] sm:$0xff] }
 0x2e0   : > { %1312 = vmatpush.msrb.mxu2 %v1158_v44 }
 0x2e2   : > { %1313 = vmatpush.msrb.mxu2 %v1157_v45 }
 0x362   : > { %v1091_v58 = vpop.f32.mrf.mxu2 }
 0x363   : > { %v1112_v60 = vadd.f32 %v1111_v57, %v1091_v58  ;;  %v1182_v57 = vld [vmem:[%s2449_s19 + $0x38] sm:$0xff]  ;;  %v1181_v58 = vld [vmem:[%s2449_s19 + $0x30] sm:$0xff] }
 0x365   : > { %v1117_v62 = vadd.f32 %v1719_v56, %v1112_v60  ;;  %v1183_v56 = vld [vmem:[%s2449_s19 + $0x40] sm:$0xff]  ;;  %v1178_v60 = vld [vmem:[%s2449_s19 + $0x18] sm:$0xff] }
 0x367   : > { %v1118_v0 = vmax.f32 %v1117_v62, 0.0  ;;  %v1175_v62 = vld [vmem:[%s2449_s19] sm:$0xff] }
 0x369   : > { %v1119_v2 = vadd.f32 %v1118_v0, %v2036_v14  ;;  %v1155_v14 = vld [vmem:[%s2446_s15 + $0x70] sm:$0xff] }
 0x36b   : > { %v1121_v5 = vmul.f32 0.01, %v1119_v2  ;;  %vm1120_vm0 = vcmp.gt.f32.partialorder %v1119_v2, 0.0 }
 0x36d   : > { %v1122_v9 = vsel %vm1120_vm0, %v1119_v2, %v1121_v5  ;;  %v1720_v2 = vld [vmem:[#allocation3] ss:$0 sm:$0xff] }
 0x36e   : > { %1654 = vmatmul.msk.f32.vlgmr.msrb.gmra.mxu0 %vm807_vm4, %v1122_v9 }
 0x36f   : > { %1341 = vmatpush.msrb.mxu0 %v1156_v6 }
 0x371   : > { %1342 = vmatpush.msrb.mxu0 %v1155_v14 }
 0x373   : > { %1343 = vmatpush.msrb.mxu0 %v1154_v11 }
 0x375   : > { %1344 = vmatpush.msrb.mxu0 %v1153_v12 }
 0x376   : > { %1656 = vmatmul.msk.f32.vlgmr.msra.gmra.mxu0 %vm732_vm1, %v1994_v3  ;;  %v1147_v3 = vld [vmem:[%s2446_s15 + $0x30] sm:$0xff] }
 0x377   : > { %1345 = vmatpush.msrb.mxu0 %v1152_v20 }
 0x379   : > { %1346 = vmatpush.msrb.mxu0 %v1151_v21 }
 0x37b   : > { %1347 = vmatpush.msrb.mxu0 %v1150_v22 }
 0x37d   : > { %1348 = vmatpush.msrb.mxu0 %v1149_v15 }
 0x37e   : > { %1657 = vmatmul.msk.f32.gmra.mxu0 %vm732_vm1, %v2013_v7  ;;  %v1143_v7 = vld [vmem:[%s2446_s15 + $0x10] sm:$0xff] }
 0x37f   : > { %1349 = vmatpush.msrb.mxu0 %v1148_v23 }
 0x381   : > { %1350 = vmatpush.msrb.mxu0 %v1147_v3 }
 0x383   : > { %1351 = vmatpush.msrb.mxu0 %v1146_v13 }
 0x385   : > { %1352 = vmatpush.msrb.mxu0 %v1145_v24 }
 0x387   : > { %1353 = vmatpush.msrb.mxu0 %v1144_v25 }
 0x389   : > { %1354 = vmatpush.msrb.mxu0 %v1143_v7 }
 0x38b   : > { %1355 = vmatpush.msrb.mxu0 %v1142_v26 }
 0x38d   : > { %1356 = vmatpush.msrb.mxu0 %v1141_v28 }
 0x3eb   : > { %v2265_v46 = vpop.f32.mrf.mxu0 }
 0x3ec   : > { %1337 = vmatmul.f32.vlgmr.msra.gmra.mxu3 %v2265_v46  ;;  %1357 = vmatmul.f32.vlgmr.msrb.gmra.mxu0 %v2265_v46 }
 0x3ed   : > { %1462 = vmatpush.msrb.mxu3 %v2265_v46 }
 0x3f3   : > { %v2270_v47 = vpop.f32.mrf.mxu0 }
 0x3f4   : > { %1314 = vmatmul.f32.vlgmr.msrb.gmra.mxu2 %v2270_v47  ;;  %1666 = vmatmul.msk.f32.vlgmr.msrb.gmra.mxu3 %vm880_vm5, %v2050_v16  ;;  %v1658_v44 = vmul.f32 -1.442695, %v2270_v47  ;;  %v1204_v47 = vld [vmem:[%s2450_s20 + $0x68] sm:$0xff] }
 0x3fb   : > { %v2275_v48 = vpop.f32.mrf.mxu0 }
 0x3fc   : > { %1317 = vmatmul.f32.gmra.mxu2 %v2275_v48  ;;  %1667 = vmatmul.msk.f32.gmra.mxu3 %vm880_vm5, %v2057_v17  ;;  %v1659_v43 = vmul.f32 -1.442695, %v2275_v48 }
 0x469   : > { %v1358_v49 = vpop.f32.mrf.mxu0 }
 0x46a   : > { %1376 = vmatpush.msra.mxu1 %v1358_v49 }
 0x46b   : > { %1660 = vmatmul.msk.f32.vlgmr.msra.gmra.mxu1 %vm880_vm5, %v2050_v16  ;;  %v1187_v16 = vld [vmem:[%s2449_s19 + $0x60] sm:$0xff] }
 0x46f   : > { %v1338_v51 = vpop.f32.mrf.mxu3 }
 0x470   : > { %1399 = vmatpush.msrb.mxu1 %v1338_v51 }
 0x472   : > { %1524 = vmatpush.msra.mxu1 %v1190_v50 }
 0x473   : > { %1661 = vmatmul.msk.f32.gmra.mxu1 %vm880_vm5, %v2057_v17  ;;  %v1184_v17 = vld [vmem:[%s2449_s19 + $0x48] sm:$0xff] }
 0x474   : > { %1525 = vmatpush.msra.mxu1 %v1189_v52 }
 0x476   : > { %1526 = vmatpush.msra.mxu1 %v1188_v53  ;;  %v1206_v53 = vld [vmem:[%s2450_s20 + $0x78] sm:$0xff] }
 0x477   : > { %v1315_v1 = vpop.f32.mrf.mxu2  ;;  %1504 = vmatpush.msra.mxu2 %v1206_v53 }
 0x478   : > { %1527 = vmatpush.msra.mxu1 %v1187_v16  ;;  %v1316_v5 = vadd.f32 %v1720_v2, %v1315_v1  ;;  %v1205_v16 = vld [vmem:[%s2450_s20 + $0x70] sm:$0xff] }
 0x479   : > { %1505 = vmatpush.msra.mxu2 %v1205_v16 }
 0x47a   : > { %1528 = vmatpush.msra.mxu1 %v1186_v54  ;;  %v1203_v54 = vld [vmem:[%s2450_s20 + $0x60] sm:$0xff] }
 0x47b   : > { %1662 = vmatmul.msk.f32.vlgmr.msrb.gmra.mxu1 %vm880_vm5, %v2064_v18  ;;  %v1180_v18 = vld [vmem:[%s2449_s19 + $0x28] sm:$0xff]  ;;  %1506 = vmatpush.msra.mxu2 %v1204_v47 }
 0x47c   : > { %1529 = vmatpush.msra.mxu1 %v1185_v55 }
 0x47d   : > { %1507 = vmatpush.msra.mxu2 %v1203_v54 }
 0x47e   : > { %1530 = vmatpush.msra.mxu1 %v1184_v17 }
 0x47f   : > { %v1318_v14 = vpop.f32.mrf.mxu2 }
 0x480   : > { %1531 = vmatpush.msra.mxu1 %v1183_v56  ;;  %v1319_v11 = vadd.f32 %v1720_v2, %v1318_v14  ;;  %v1464_v56 = vpop.f32.mrf.mxu3  ;;  %v1198_v2 = vld [vmem:[%s2450_s20 + $0x38] sm:$0xff] }
 0x482   : > { %1532 = vmatpush.msra.mxu1 %v1182_v57  ;;  %v1202_v57 = vld [vmem:[%s2450_s20 + $0x58] sm:$0xff] }
 0x483   : > { %1663 = vmatmul.msk.f32.gmra.mxu1 %vm880_vm5, %v2070_v19  ;;  %v1176_v19 = vld [vmem:[%s2449_s19 + $0x8] sm:$0xff]  ;;  %1508 = vmatpush.msra.mxu2 %v1202_v57 }
 0x484   : > { %1533 = vmatpush.msra.mxu1 %v1181_v58  ;;  %v1201_v58 = vld [vmem:[%s2450_s20 + $0x50] sm:$0xff] }
 0x485   : > { %1509 = vmatpush.msra.mxu2 %v1201_v58 }
 0x486   : > { %1534 = vmatpush.msra.mxu1 %v1180_v18 }
 0x488   : > { %1535 = vmatpush.msra.mxu1 %v1179_v59 }
 0x48a   : > { %1536 = vmatpush.msra.mxu1 %v1178_v60  ;;  %v1200_v60 = vld [vmem:[%s2450_s20 + $0x48] sm:$0xff] }
 0x48b   : > { %1510 = vmatpush.msra.mxu2 %v1200_v60 }
 0x48c   : > { %1537 = vmatpush.msra.mxu1 %v1177_v61 }
 0x48e   : > { %1538 = vmatpush.msra.mxu1 %v1176_v19  ;;  %v1199_v19 = vld [vmem:[%s2450_s20 + $0x40] sm:$0xff] }
 0x48f   : > { %1511 = vmatpush.msra.mxu2 %v1199_v19 }
 0x490   : > { %1539 = vmatpush.msra.mxu1 %v1175_v62 }
 0x491   : > { %1540 = vmatmul.f32.vlgmr.msra.gmra.mxu1 %v2265_v46  ;;  %1512 = vmatpush.msra.mxu2 %v1198_v2 }
 0x4e8   : > { %v1378_v63 = vpop.f32.mrf.mxu1 }
 0x4f0   : > { %v1381_v0 = vpop.f32.mrf.mxu1 }
 0x4f8   : > { %v1401_v4 = vpop.f32.mrf.mxu1 }
 0x4f9   : > { %v1402_v6 = vadd.f32 %v1401_v4, %v1378_v63  ;;  %v1467_v4 = vpop.f32.mrf.mxu3 }
 0x4fb   : > { %v1407_v8 = vadd.f32 %v1402_v6, %v1316_v5  ;;  %v1197_v6 = vld [vmem:[%s2450_s20 + $0x30] sm:$0xff] }
 0x4fc   : > { %1513 = vmatpush.msra.mxu2 %v1197_v6 }
 0x4fd   : > { %v1664_v9 = vmul.f32 -1.442695, %v1407_v8 }
 0x4ff   : > { %1738 = vpow2.f32 %v1664_v9 }
 0x500   : > { %v1404_v10 = vpop.f32.mrf.mxu1 }
 0x501   : > { %v1405_v12 = vadd.f32 %v1404_v10, %v1381_v0  ;;  %v1196_v10 = vld [vmem:[%s2450_s20 + $0x28] sm:$0xff] }
 0x502   : > { %1514 = vmatpush.msra.mxu2 %v1196_v10 }
 0x503   : > { %v1408_v20 = vadd.f32 %v1405_v12, %v1319_v11 }
 0x505   : > { %v1739_v21 = vpop.eup %1738  ;;  %v1665_v22 = vmul.f32 -1.442695, %v1408_v20 }
 0x506   : > { %v1415_v15 = vadd.f32 1.0, %v1739_v21  ;;  %v1195_v21 = vld [vmem:[%s2450_s20 + $0x20] sm:$0xff] }
 0x507   : > { %1740 = vpow2.f32 %v1665_v22  ;;  %1515 = vmatpush.msra.mxu2 %v1195_v21 }
 0x508   : > { %1742 = vrcp.f32 %v1415_v15  ;;  %v1428_v37 = vand.u32 2147483648, %v1415_v15  ;;  %vm1422_vm13 = vweird.f32 %v1415_v15  ;;  %v1426_v38 = vand.u32 2147483647, %v1415_v15 }
 0x50a   : > { %v1429_v41 = vor.u32 1.1754944e-38, %v1428_v37  ;;  %vm1427_vm15 = vcmp.eq.f32.partialorder %v1426_v38, 8.507059e+37 }
 0x50d   : > { %v1741_v23 = vpop.eup %1740 }
 0x50e   : > { %v1416_v3 = vadd.f32 1.0, %v1741_v23  ;;  %v1743_v13 = vpop.eup %1742 }
 0x50f   : > { %v1418_v24 = vmul.f32 %v1743_v13, %v1415_v15  ;;  %vm1423_vm12 = vweird.f32 %v1743_v13 }
 0x510   : > { %1744 = vrcp.f32 %v1416_v3  ;;  %v1443_v28 = vand.u32 2147483648, %v1416_v3  ;;  %v1441_v30 = vand.u32 2147483647, %v1416_v3  ;;  %vm1437_vm5 = vweird.f32 %v1416_v3  ;;  %vm1424_vm14 = vmor %vm1422_vm13, %vm1423_vm12 }
 0x511   : > { %v1419_v27 = vsub.f32 1.0, %v1418_v24  ;;  %1746 = vpow2.f32 %v1659_v43  ;;  %v1193_v24 = vld [vmem:[%s2450_s20 + $0x10] sm:$0xff] }
 0x512   : > { %v1444_v33 = vor.u32 1.1754944e-38, %v1443_v28  ;;  %vm1442_vm11 = vcmp.eq.f32.partialorder %v1441_v30, 8.507059e+37  ;;  %1748 = vpow2.f32 %v1658_v44  ;;  %v1191_v30 = vld [vmem:[%s2450_s20] sm:$0xff] }
 0x513   : > { %v1420_v32 = vmul.f32 %v1743_v13, %v1419_v27 }
 0x515   : > { %v1421_v36 = vadd.f32 %v1743_v13, %v1420_v32  ;;  %v1721_v32 = vld [vmem:[%s2451_s21] ss:$0 sm:$0xff] }
 0x516   : > { %v1745_v25 = vpop.eup %1744 }
 0x517   : > { %v1433_v7 = vmul.f32 %v1745_v25, %v1416_v3  ;;  %vm1438_vm1 = vweird.f32 %v1745_v25  ;;  %v1425_v39 = vsel %vm1424_vm14, %v1743_v13, %v1421_v36  ;;  %v1747_v45 = vpop.eup %1746  ;;  %v1194_v3 = vld [vmem:[%s2450_s20 + $0x18] sm:$0xff] }
 0x518   : > { %vm1439_vm10 = vmor %vm1437_vm5, %vm1438_vm1  ;;  %v1430_v42 = vsel %vm1427_vm15, %v1429_v41, %v1425_v39  ;;  %v1264_v49 = vadd.f32 1.0, %v1747_v45  ;;  %v1749_v50 = vpop.eup %1748  ;;  %1516 = vmatpush.msra.mxu2 %v1194_v3 }
 0x519   : > { %v1434_v26 = vsub.f32 1.0, %v1433_v7  ;;  %v1263_v51 = vadd.f32 1.0, %v1749_v50 }
 0x51a   : > { %1750 = vrcp.f32 %v1264_v49  ;;  %vm1285_vm2 = vweird.f32 %v1264_v49  ;;  %v1291_v61 = vand.u32 2147483648, %v1264_v49  ;;  %v1289_v63 = vand.u32 2147483647, %v1264_v49  ;;  %1517 = vmatpush.msra.mxu2 %v1193_v24 }
 0x51b   : > { %v1435_v29 = vmul.f32 %v1745_v25, %v1434_v26  ;;  %1752 = vrcp.f32 %v1263_v51  ;;  %vm1270_vm8 = vweird.f32 %v1263_v51  ;;  %v1276_v20 = vand.u32 2147483648, %v1263_v51  ;;  %v1192_v26 = vld [vmem:[%s2450_s20 + $0x8] sm:$0xff] }
 0x51c   : > { %v1292_v5 = vor.u32 1.1754944e-38, %v1291_v61  ;;  %vm1290_vm7 = vcmp.eq.f32.partialorder %v1289_v63, 8.507059e+37  ;;  %v1274_v23 = vand.u32 2147483647, %v1263_v51  ;;  %1518 = vmatpush.msra.mxu2 %v1192_v26 }
 0x51d   : > { %v1436_v31 = vadd.f32 %v1745_v25, %v1435_v29  ;;  %v1277_v13 = vor.u32 1.1754944e-38, %v1276_v20 }
 0x51e   : > { %vm1275_vm1 = vcmp.eq.f32.partialorder %v1274_v23, 8.507059e+37  ;;  %1519 = vmatpush.msra.mxu2 %v1191_v30 }
 0x51f   : > { %v1440_v34 = vsel %vm1439_vm10, %v1745_v25, %v1436_v31 }
 0x520   : > { %v1445_v35 = vsel %vm1442_vm11, %v1444_v33, %v1440_v34  ;;  %v1751_v52 = vpop.eup %1750  ;;  %v1541_v33 = vpop.f32.mrf.mxu1 }
 0x521   : > { %1477 = vperm.xlu2 %1717, %v1445_v35   ;;  %v1281_v48 = vmul.f32 %v1751_v52, %v1264_v49  ;;  %v1753_v17 = vpop.eup %1752  ;;  %vm1286_vm3 = vweird.f32 %v1751_v52 }
 0x522   : > { %v1266_v59 = vmul.f32 %v1753_v17, %v1263_v51  ;;  %vm2363_vm6 = vmor %vm1285_vm2, %vm1286_vm3  ;;  %vm1271_vm9 = vweird.f32 %v1753_v17 }
 0x523   : > { %v1282_v55 = vsub.f32 1.0, %v1281_v48  ;;  %vm1272_vm0 = vmor %vm1270_vm8, %vm1271_vm9 }
 0x524   : > { %v1267_v0 = vsub.f32 1.0, %v1266_v59 }
 0x525   : > { %v1283_v18 = vmul.f32 %v1751_v52, %v1282_v55 }
 0x526   : > { %v1268_v9 = vmul.f32 %v1753_v17, %v1267_v0 }
 0x527   : > { %v1284_v62 = vadd.f32 %v1751_v52, %v1283_v18 }
 0x528   : > { %v1269_v15 = vadd.f32 %v1753_v17, %v1268_v9 }
 0x529   : > { %1472 = vperm.xlu2 %1717, %v1430_v42   ;;  %v1288_v8 = vsel %vm2363_vm6, %v1751_v52, %v1284_v62 }
 0x52a   : > { %v1293_v12 = vsel %vm1290_vm7, %v1292_v5, %v1288_v8  ;;  %v1273_v25 = vsel %vm1272_vm0, %v1753_v17, %v1269_v15 }
 0x52b   : > { %v1278_v28 = vsel %vm1275_vm1, %v1277_v13, %v1273_v25 }
 0x57b   : > { %v1478_v14 = vpop.permute.xlu2 %1477 }
 0x57c   : > { %v1481_v11 = vmul.f32 %v1478_v14, %v1467_v4 }
 0x57e   : > { %v1483_v22 = vmul.f32 %v1481_v11, %v1293_v12 }
 0x580   : > { %1498 = vmatpush.msra.mxu0 %v1483_v22 }
 0x583   : > { %v1473_v7 = vpop.permute.xlu2 %1472 }
 0x584   : > { %v1480_v27 = vmul.f32 %v1473_v7, %v1464_v56 }
 0x586   : > { %v1482_v29 = vmul.f32 %v1480_v27, %v1278_v28 }
 0x588   : > { %1499 = vmatpush.msra.mxu0 %v1482_v29 }
 0x589   : > { %1668 = vmatmul.msk.f32.vlgmr.msra.gmra.mxu0 %vm807_vm4, %v2091_v40 }
 0x606   : > { %v1501_v31 = vpop.f32.mrf.mxu0 }
 0x607   : > { %1520 = vmatmul.f32.vlgmr.msra.gmra.mxu2 %v1501_v31 }
 0x68a   : > { %v1521_v34 = vpop.f32.mrf.mxu2 }
 0x68b   : > { %v1542_v35 = vadd.f32 %v1541_v33, %v1521_v34 }
 0x68d   : > { %v1547_v40 = vadd.f32 %v1721_v32, %v1542_v35 }
 0x68f   : > { %v1548_v36 = vmax.f32 %v1547_v40, 0.0 }
 0x691   : > { %v1549_v37 = vadd.f32 %v1548_v36, %v2265_v46 }
 0x693   : > { %1550 = vst [vmem:[%s678_s6] sm:$0xff] %v1549_v37 }
 0x694   : > { %1781 = shalt.err (!%p1778_p3)
}
 0x695   : > { %1675 = dma.vmem_to_hbm [thread:$0]  (%p1978_p5), %s1565_s27, 128, %s1567_s10, %s1552_s9  }
 0x696 PF: > { %p1681_p4 = scmp.ge.s32.totalorder %s1816_s1, 2  ;;  %s1578_s7 = sand.u32 1, %s1804_s4  }
 0x697   : > { %s1579_s6 = scalar_lea.sflag [#allocation5], %s1578_s7 }
 0x698   : > { %p1678_p7 = pnand %p1681_p4, %p1982_p6 }
 0x69a   : > { %p1679_p8 = pneg %p1678_p7 }
 0x69c   : > { %1799 = dma.done.wait (%p1679_p8), %s1579_s6, 128  }
 0x69d   : > { %1801 = vsyncadd (%p1679_p8), %s1579_s6, 4294967168  ;;  %s2491_s1 = sld [smem:[#allocation8_spill]]  ;;  %s2494_s4 = smov %s1808_s0 }
 0x69e   : > { %s2492_s28 = sld [smem:[#allocation7_spill]] }
 0x69f   : > { %s2493_s23 = sld [smem:[#allocation9_spill]] }
 0x6a3   : > { %p36_p9 = scmp.ge.s32.totalorder %s2491_s1, 4  }
 0x6a4   : > { %s2495_s0 = smov %s2492_s28 }
 0x6a5   :  { %38 = sbr.rel (!%p36_p9) target bundleno = 14 (0xe), region = 143 }
 0x6aa   :  { %1585 = vsyncpa [#allocation5], 1 }
 0x6ab   :  { %1587 = vsyncpa [#allocation5 + $0x1], 1 }

</bundles_post_ra>
